<compile_context>
chip_gen: v7x
topology: tpu7x:2x2x1
jax: 0.10.0
libtpu: 0.0.40
codegen_flags: <defaults>
</compile_context>

<pallas_src>
import jax
import jax.numpy as jnp
from jax.experimental import pallas as pl
from jax.experimental.pallas import tpu as pltpu


# ----------------------------------------------------------------------------
# Pallas kernel: GCN trunk + global_add_pool for a block of GB graphs per step.
# ----------------------------------------------------------------------------
def gcn_block_kernel(a_ref, x_ref, m_ref, w1_ref, w2_ref, b_ref, out_ref):
    gb, nb, _ = a_ref.shape          # GB graphs, B (sublane-padded) nodes/graph
    f = x_ref.shape[-1]
    h_dim = w1_ref.shape[-1]
    out_w = out_ref.shape[-1]

    a = a_ref[...]                                        # [GB, B, B]  bf16
    x2d = x_ref[...].reshape(gb * nb, f)                  # [GB*B, F]   bf16
    biases = b_ref[...]                                   # [2, H]      f32
    b1 = biases[0:1, :].reshape(1, 1, h_dim)
    b2 = biases[1:2, :].reshape(1, 1, h_dim)

    # --- GCNConv layer 1: relu(A_hat @ (X @ W1) + b1) ---
    h = jnp.dot(x2d, w1_ref[...], preferred_element_type=jnp.float32)    # [GB*B, H]
    h = jnp.einsum('gij,gjh->gih', a,
                   h.reshape(gb, nb, h_dim).astype(jnp.bfloat16),
                   preferred_element_type=jnp.float32)                   # [GB, B, H]
    h = jnp.maximum(h + b1, 0.0)                                         # f32

    # --- GCNConv layer 2: relu(A_hat @ (H @ W2) + b2) ---
    h = jnp.dot(h.reshape(gb * nb, h_dim).astype(jnp.bfloat16), w2_ref[...],
                preferred_element_type=jnp.float32)                      # [GB*B, H]
    h = jnp.einsum('gij,gjh->gih', a,
                   h.reshape(gb, nb, h_dim).astype(jnp.bfloat16),
                   preferred_element_type=jnp.float32)                   # [GB, B, H]
    h = jnp.maximum(h + b2, 0.0)                                         # f32

    # --- global_add_pool: masked sublane reduction (XLU), f32 accumulation ---
    m = m_ref[...]                                        # [GB, B, 1] f32 (1 real / 0 pad)
    pooled = jnp.sum(h * m, axis=1)                       # [GB, H] f32

    if out_w == h_dim:
        out_ref[...] = pooled
    else:   # lane-pad the store to a dense multiple of 128 lanes
        out_ref[...] = jnp.concatenate(
            [pooled, jnp.zeros((gb, out_w - h_dim), jnp.float32)], axis=-1)


def _vmem_limit_bytes(gb, b, f, h, out_w):
    bf16, f32 = 2, 4
    per_step_in = gb * b * b * bf16 + gb * b * f * bf16 + gb * b * f32
    per_step_out = gb * out_w * f32
    weights = f * h * bf16 + h * h * bf16 + 2 * h * f32
    interm = 6 * gb * b * h * f32
    total = 2 * (per_step_in + per_step_out) + 2 * weights + interm
    # 4x headroom for compiler scratch / (8,128) layout padding; cap at 40 MiB
    # so the scoped limit stays comfortably inside v7x's 64 MiB physical VMEM.
    return int(min(max(4 * total, 4 << 20), 40 << 20))


def gcn_pooled(a_blocks, x_blocks, pool_mask, w1, b1, w2, b2, *, graphs_per_step=None):
    """GCN trunk + global_add_pool; returns pooled graph features [G, H] (f32)."""
    G, B, _ = a_blocks.shape
    F = x_blocks.shape[-1]
    H = w1.shape[-1]
    OUT_W = max(128, ((H + 127) // 128) * 128)     # lane-dense output width

    if graphs_per_step is None:
        # Stacked matmul M = GB*B ~ 256: fills the 256-wide MXU on v6e/v7x and
        # is >= the 128-wide v5e MXU, without inflating padded-A HBM bytes.
        graphs_per_step = max(1, 256 // B)
    GB = max(1, min(graphs_per_step, G))
    Gpad = ((G + GB - 1) // GB) * GB
    if Gpad != G:     # pad with all-zero graphs (zero A/X/mask -> pooled == 0)
        pad = Gpad - G
        a_blocks = jnp.pad(a_blocks, ((0, pad), (0, 0), (0, 0)))
        x_blocks = jnp.pad(x_blocks, ((0, pad), (0, 0), (0, 0)))
        pool_mask = jnp.pad(pool_mask, ((0, pad), (0, 0), (0, 0)))

    # bf16 for the dominant byte streams + GCN weights; f32 accumulation inside.
    a_bf = a_blocks.astype(jnp.bfloat16)
    x_bf = x_blocks.astype(jnp.bfloat16)
    m_f32 = pool_mask.astype(jnp.float32)
    w1_bf = w1.astype(jnp.bfloat16)
    w2_bf = w2.astype(jnp.bfloat16)
    biases = jnp.concatenate([b1.reshape(1, H), b2.reshape(1, H)], axis=0)  # [2, H]

    grid_spec = pltpu.PrefetchScalarGridSpec(
        num_scalar_prefetch=0,
        grid=(Gpad // GB,),
        in_specs=[
            pl.BlockSpec((GB, B, B), lambda g: (g, 0, 0)),   # A_hat blocks (per step)
            pl.BlockSpec((GB, B, F), lambda g: (g, 0, 0)),   # node features
            pl.BlockSpec((GB, B, 1), lambda g: (g, 0, 0)),   # pooling mask
            pl.BlockSpec((F, H), lambda g: (0, 0)),          # W1 (grid-invariant)
            pl.BlockSpec((H, H), lambda g: (0, 0)),          # W2
            pl.BlockSpec((2, H), lambda g: (0, 0)),          # [b1; b2]
        ],
        out_specs=pl.BlockSpec((GB, OUT_W), lambda g: (g, 0)),
    )
    # TODO(synk): mark the grid-invariant weight specs pipeline_mode=pl.Buffered(1)
    # (and raise A/X to Buffered(3) at large B) once pipeline_mode support is
    # confirmed on the target jax version; omitted here for portability.

    pooled = pl.pallas_call(
        gcn_block_kernel,
        out_shape=jax.ShapeDtypeStruct((Gpad, OUT_W), jnp.float32),
        grid_spec=grid_spec,
        compiler_params=pltpu.CompilerParams(
            dimension_semantics=("parallel",),
            vmem_limit_bytes=_vmem_limit_bytes(GB, B, F, H, OUT_W),
        ),
    )(a_bf, x_bf, m_f32, w1_bf, w2_bf, biases)

    return pooled[:G, :H]


def gcn_forward(a_blocks, x_blocks, pool_mask,
                w1, b1, w2, b2, wf1, bf1, wf2, bf2):
    pooled = gcn_pooled(a_blocks, x_blocks, pool_mask, w1, b1, w2, b2)
    # Backbone FC head hoisted to plain XLA: one batched [G,H]@[H,H] matmul over
    # all graphs instead of M=1 MXU passes + 4 extra input specs per grid step.
    z = jnp.maximum(pooled @ wf1 + bf1, 0.0)
    return jax.nn.sigmoid(z @ wf2 + bf2)                  # [G, 1]


# ----------------------------------------------------------------------------
# Plain-JAX preprocessing: per-graph padded blocks of the normalized adjacency
# (block-diagonal structure of the batched graph), features and pooling masks.
# `max_nodes_per_graph` is static dataset metadata -> no host sync / recompiles.
# ----------------------------------------------------------------------------
def build_graph_blocks(x, edge_index, batch, num_graphs, max_nodes_per_graph):
    """Returns (a_blocks [G,B,B], x_blocks [G,B,F], pool_mask [G,B,1]) where
    B = max_nodes_per_graph rounded up to a multiple of 8 and each A block is
    D^-1/2 (A + I) D^-1/2 for that graph (matching PyG gcn_norm)."""
    n, f = x.shape
    b = max(8, ((int(max_nodes_per_graph) + 7) // 8) * 8)     # sublane-aligned
    counts = jnp.zeros((num_graphs,), jnp.int32).at[batch].add(1)
    offsets = jnp.concatenate([jnp.zeros((1,), jnp.int32),
                               jnp.cumsum(counts)[:-1]])
    local = jnp.arange(n, dtype=jnp.int32) - offsets[batch]

    src, dst = edge_index[0], edge_index[1]
    a_blocks = jnp.zeros((num_graphs, b, b), jnp.float32)
    a_blocks = a_blocks.at[batch[dst], local[dst], local[src]].add(1.0)
    a_blocks = a_blocks.at[batch, local, local].add(1.0)      # self loops (real nodes)
    deg = a_blocks.sum(axis=2)                                # [G, B]
    dinv = jnp.where(deg > 0, 1.0 / jnp.sqrt(deg), 0.0)
    a_blocks = dinv[:, :, None] * a_blocks * dinv[:, None, :]

    x_blocks = jnp.zeros((num_graphs, b, f), x.dtype).at[batch, local].set(x)
    pool_mask = jnp.zeros((num_graphs, b, 1), jnp.float32).at[batch, local, 0].set(1.0)
    return a_blocks, x_blocks, pool_mask


# ----------------------------------------------------------------------------
# Pure-JAX reference (dense formulation, f32) for a correctness check.
# ----------------------------------------------------------------------------
def _dense_reference(x, edge_index, batch, num_graphs,
                     w1, b1, w2, b2, wf1, bf1, wf2, bf2):
    n = x.shape[0]
    src, dst = edge_index[0], edge_index[1]
    adj = jnp.zeros((n, n), jnp.float32).at[dst, src].add(1.0)
    adj = adj + jnp.eye(n, dtype=jnp.float32)
    deg = adj.sum(axis=1)
    dinv = jnp.where(deg > 0, 1.0 / jnp.sqrt(deg), 0.0)
    a_hat = dinv[:, None] * adj * dinv[None, :]
    pool = (batch[None, :] == jnp.arange(num_graphs)[:, None]).astype(jnp.float32)

    h = jnp.maximum(a_hat @ (x @ w1) + b1, 0.0)
    h = jnp.maximum(a_hat @ (h @ w2) + b2, 0.0)
    pooled = pool @ h
    z = jnp.maximum(pooled @ wf1 + bf1, 0.0)
    return jax.nn.sigmoid(z @ wf2 + bf2)


def glorot(key, shape):
    fan_in, fan_out = shape[0], shape[1]
    limit = jnp.sqrt(6.0 / (fan_in + fan_out))
    return jax.random.uniform(key, shape, jnp.float32, -limit, limit)


if __name__ == "__main__":
    # Small synthetic problem: 2 graphs of 8 nodes each, 8 input features, nhid=32.
    num_features = 8
    nhid = 32
    nodes_per_graph = 8          # static dataset-metadata bound (no host sync)
    num_graphs = 2
    N = nodes_per_graph * num_graphs

    key = jax.random.PRNGKey(0)
    keys = jax.random.split(key, 8)

    # Node features.
    x = jax.random.normal(keys[0], (N, num_features), jnp.float32)

    # Edge index: symmetric ring inside each graph (COO, [2, E]).
    src_list, dst_list = [], []
    for g in range(num_graphs):
        base = g * nodes_per_graph
        for i in range(nodes_per_graph):
            a = base + i
            b = base + (i + 1) % nodes_per_graph
            src_list += [a, b]
            dst_list += [b, a]
    edge_index = jnp.array([src_list, dst_list], dtype=jnp.int32)

    # Batch assignment (graph id per node, sorted as PyG produces).
    batch = jnp.repeat(jnp.arange(num_graphs, dtype=jnp.int32), nodes_per_graph)

    # Deterministic parameter init (GCNConv glorot weights, zero bias;
    # backbone xavier_uniform gain=1.414 approximated with scaled glorot, zero bias).
    w1 = glorot(keys[1], (num_features, nhid))
    b1 = jnp.zeros((1, nhid), jnp.float32)
    w2 = glorot(keys[2], (nhid, nhid))
    b2 = jnp.zeros((1, nhid), jnp.float32)
    wf1 = 1.414 * glorot(keys[3], (nhid, nhid))
    bf1 = jnp.zeros((1, nhid), jnp.float32)
    wf2 = 1.414 * glorot(keys[4], (nhid, 1))
    bf2 = jnp.zeros((1, 1), jnp.float32)

    # Per-graph block-diagonal preprocessing (static B from dataset metadata).
    a_blocks, x_blocks, pool_mask = build_graph_blocks(
        x, edge_index, batch, num_graphs, nodes_per_graph)

    out = gcn_forward(a_blocks, x_blocks, pool_mask,
                      w1, b1, w2, b2, wf1, bf1, wf2, bf2)
    out = jax.block_until_ready(out)

    # Sanity + correctness vs. dense f32 reference (bf16-stream tolerance).
    ref = _dense_reference(x, edge_index, batch, num_graphs,
                           w1, b1, w2, b2, wf1, bf1, wf2, bf2)
    assert out.shape == (num_graphs, 1)
    assert bool(jnp.all(jnp.isfinite(out)))
    assert bool(jnp.all((out >= 0.0) & (out <= 1.0)))
    assert bool(jnp.allclose(out, ref, atol=5e-2, rtol=5e-2))
    print("KERNEL_OK")
</pallas_src>

<mosaic_0001>
module attributes {stable_mosaic.version = 11 : i64} {
  func.func @gcn_block_kernel(%arg0: i32, %arg1: memref<2x8x8xbf16, #tpu.memory_space<vmem>>, %arg2: memref<2x8x8xbf16, #tpu.memory_space<vmem>>, %arg3: memref<2x8x1xf32, #tpu.memory_space<vmem>>, %arg4: memref<8x32xbf16, #tpu.memory_space<vmem>>, %arg5: memref<32x32xbf16, #tpu.memory_space<vmem>>, %arg6: memref<2x32xf32, #tpu.memory_space<vmem>>, %arg7: memref<2x128xf32, #tpu.memory_space<vmem>>) attributes {dimension_semantics = [#tpu.dimension_semantics<parallel>], iteration_bounds = array<i64: 1>, scalar_prefetch = 0 : i64, scratch_operands = 0 : i64, tpu.core_type = #tpu.core_type<tc>, window_params = [{transform_indices = @transform_0, window_bounds = array<i64: 2, 8, 8>}, {transform_indices = @transform_1, window_bounds = array<i64: 2, 8, 8>}, {transform_indices = @transform_2, window_bounds = array<i64: 2, 8, 1>}, {pipeline_mode = #tpu.pipeline_mode<synchronous>, transform_indices = @transform_3, window_bounds = array<i64: 8, 32>}, {pipeline_mode = #tpu.pipeline_mode<synchronous>, transform_indices = @transform_4, window_bounds = array<i64: 32, 32>}, {pipeline_mode = #tpu.pipeline_mode<synchronous>, transform_indices = @transform_5, window_bounds = array<i64: 2, 32>}, {transform_indices = @transform_6, window_bounds = array<i64: 2, 128>}]} {
    %c0 = arith.constant 0 : index
    %c0_0 = arith.constant 0 : index
    %c0_1 = arith.constant 0 : index
    %0 = vector.load %arg1[%c0, %c0_0, %c0_1] : memref<2x8x8xbf16, #tpu.memory_space<vmem>>, vector<2x8x8xbf16>
    %c0_2 = arith.constant 0 : index
    %c0_3 = arith.constant 0 : index
    %c0_4 = arith.constant 0 : index
    %1 = vector.load %arg2[%c0_2, %c0_3, %c0_4] : memref<2x8x8xbf16, #tpu.memory_space<vmem>>, vector<2x8x8xbf16>
    %2 = vector.shape_cast %1 : vector<2x8x8xbf16> to vector<16x8xbf16>
    %c0_5 = arith.constant 0 : index
    %c0_6 = arith.constant 0 : index
    %3 = vector.load %arg6[%c0_5, %c0_6] : memref<2x32xf32, #tpu.memory_space<vmem>>, vector<2x32xf32>
    %4 = vector.extract_strided_slice %3 {offsets = [0, 0], sizes = [1, 32], strides = [1, 1]} : vector<2x32xf32> to vector<1x32xf32>
    %5 = vector.shape_cast %4 : vector<1x32xf32> to vector<1x1x32xf32>
    %6 = vector.extract_strided_slice %3 {offsets = [1, 0], sizes = [1, 32], strides = [1, 1]} : vector<2x32xf32> to vector<1x32xf32>
    %7 = vector.shape_cast %6 : vector<1x32xf32> to vector<1x1x32xf32>
    %c0_7 = arith.constant 0 : index
    %c0_8 = arith.constant 0 : index
    %8 = vector.load %arg4[%c0_7, %c0_8] : memref<8x32xbf16, #tpu.memory_space<vmem>>, vector<8x32xbf16>
    %cst = arith.constant dense<0.000000e+00> : vector<16x32xf32>
    %9 = tpu.matmul %2, %8, %cst {dimension_numbers = #tpu.dot_dimension_numbers<[1], [0], [0], [1], [0, 0, 1, 1], [], []>} : vector<16x8xbf16>, vector<8x32xbf16>, vector<16x32xf32> -> vector<16x32xf32>
    %10 = vector.shape_cast %9 : vector<16x32xf32> to vector<2x8x32xf32>
    %11 = arith.truncf %10 : vector<2x8x32xf32> to vector<2x8x32xbf16>
    "tpu.trace_start"() <{level = 10 : i32, message = "gij,gjh->gih"}> : () -> ()
    %cst_9 = arith.constant dense<0.000000e+00> : vector<2x8x32xf32>
    %12 = tpu.matmul %0, %11, %cst_9 {dimension_numbers = #tpu.dot_dimension_numbers<[2], [1], [1], [2], [0, 0, 0, 1, 1, 2], [0], [0]>} : vector<2x8x8xbf16>, vector<2x8x32xbf16>, vector<2x8x32xf32> -> vector<2x8x32xf32>
    "tpu.trace_stop"() : () -> ()
    %13 = vector.broadcast %5 : vector<1x1x32xf32> to vector<2x8x32xf32>
    %14 = arith.addf %12, %13 : vector<2x8x32xf32>
    %cst_10 = arith.constant 0.000000e+00 : f32
    %15 = vector.broadcast %cst_10 : f32 to vector<2x8x32xf32>
    %16 = arith.maximumf %14, %15 : vector<2x8x32xf32>
    %17 = vector.shape_cast %16 : vector<2x8x32xf32> to vector<16x32xf32>
    %18 = arith.truncf %17 : vector<16x32xf32> to vector<16x32xbf16>
    %c0_11 = arith.constant 0 : index
    %c0_12 = arith.constant 0 : index
    %19 = vector.load %arg5[%c0_11, %c0_12] : memref<32x32xbf16, #tpu.memory_space<vmem>>, vector<32x32xbf16>
    %cst_13 = arith.constant dense<0.000000e+00> : vector<16x32xf32>
    %20 = tpu.matmul %18, %19, %cst_13 {dimension_numbers = #tpu.dot_dimension_numbers<[1], [0], [0], [1], [0, 0, 1, 1], [], []>} : vector<16x32xbf16>, vector<32x32xbf16>, vector<16x32xf32> -> vector<16x32xf32>
    %21 = vector.shape_cast %20 : vector<16x32xf32> to vector<2x8x32xf32>
    %22 = arith.truncf %21 : vector<2x8x32xf32> to vector<2x8x32xbf16>
    "tpu.trace_start"() <{level = 10 : i32, message = "gij,gjh->gih"}> : () -> ()
    %cst_14 = arith.constant dense<0.000000e+00> : vector<2x8x32xf32>
    %23 = tpu.matmul %0, %22, %cst_14 {dimension_numbers = #tpu.dot_dimension_numbers<[2], [1], [1], [2], [0, 0, 0, 1, 1, 2], [0], [0]>} : vector<2x8x8xbf16>, vector<2x8x32xbf16>, vector<2x8x32xf32> -> vector<2x8x32xf32>
    "tpu.trace_stop"() : () -> ()
    %24 = vector.broadcast %7 : vector<1x1x32xf32> to vector<2x8x32xf32>
    %25 = arith.addf %23, %24 : vector<2x8x32xf32>
    %cst_15 = arith.constant 0.000000e+00 : f32
    %26 = vector.broadcast %cst_15 : f32 to vector<2x8x32xf32>
    %27 = arith.maximumf %25, %26 : vector<2x8x32xf32>
    %c0_16 = arith.constant 0 : index
    %c0_17 = arith.constant 0 : index
    %c0_18 = arith.constant 0 : index
    %28 = vector.load %arg3[%c0_16, %c0_17, %c0_18] : memref<2x8x1xf32, #tpu.memory_space<vmem>>, vector<2x8x1xf32>
    %29 = vector.broadcast %28 : vector<2x8x1xf32> to vector<2x8x32xf32>
    %30 = arith.mulf %27, %29 : vector<2x8x32xf32>
    %cst_19 = arith.constant dense<0.000000e+00> : vector<2x32xf32>
    %31 = vector.multi_reduction <add>, %30, %cst_19 [1] : vector<2x8x32xf32> to vector<2x32xf32>
    %cst_20 = arith.constant 0.000000e+00 : f32
    %32 = vector.broadcast %cst_20 : f32 to vector<2x96xf32>
    %33 = tpu.concatenate %31, %32 in 1 : vector<2x32xf32>, vector<2x96xf32> -> vector<2x128xf32>
    %c0_21 = arith.constant 0 : index
    %c0_22 = arith.constant 0 : index
    %34 = vector.load %arg7[%c0_21, %c0_22] : memref<2x128xf32, #tpu.memory_space<vmem>>, vector<2x128xf32>
    tpu.vector_store %arg7[%c0_21, %c0_22], %33 {strides = array<i32>} : memref<2x128xf32, #tpu.memory_space<vmem>>, vector<2x128xf32>,
    return
  }
  func.func @transform_0(%arg0: i32) -> (i32, i32, i32) {
    %c0_i32 = arith.constant 0 : i32
    %c0_i32_0 = arith.constant 0 : i32
    %c0_i32_1 = arith.constant 0 : i32
    return %arg0, %c0_i32, %c0_i32_0 : i32, i32, i32
  }
  func.func @transform_1(%arg0: i32) -> (i32, i32, i32) {
    %c0_i32 = arith.constant 0 : i32
    %c0_i32_0 = arith.constant 0 : i32
    %c0_i32_1 = arith.constant 0 : i32
    return %arg0, %c0_i32, %c0_i32_0 : i32, i32, i32
  }
  func.func @transform_2(%arg0: i32) -> (i32, i32, i32) {
    %c0_i32 = arith.constant 0 : i32
    %c0_i32_0 = arith.constant 0 : i32
    %c0_i32_1 = arith.constant 0 : i32
    return %arg0, %c0_i32, %c0_i32_0 : i32, i32, i32
  }
  func.func @transform_3(%arg0: i32) -> (i32, i32) {
    %c0_i32 = arith.constant 0 : i32
    %c0_i32_0 = arith.constant 0 : i32
    %c0_i32_1 = arith.constant 0 : i32
    return %c0_i32, %c0_i32_0 : i32, i32
  }
  func.func @transform_4(%arg0: i32) -> (i32, i32) {
    %c0_i32 = arith.constant 0 : i32
    %c0_i32_0 = arith.constant 0 : i32
    %c0_i32_1 = arith.constant 0 : i32
    return %c0_i32, %c0_i32_0 : i32, i32
  }
  func.func @transform_5(%arg0: i32) -> (i32, i32) {
    %c0_i32 = arith.constant 0 : i32
    %c0_i32_0 = arith.constant 0 : i32
    %c0_i32_1 = arith.constant 0 : i32
    return %c0_i32, %c0_i32_0 : i32, i32
  }
  func.func @transform_6(%arg0: i32) -> (i32, i32) {
    %c0_i32 = arith.constant 0 : i32
    %c0_i32_0 = arith.constant 0 : i32
    return %arg0, %c0_i32 : i32, i32
  }
}

</mosaic_0001>

<bundles_post_ra>
// kernel: tpu_custom_call.1
= control target key start
LH: loop header
LB: loop body
LE: loop exit
PB: predicated region body
PF: predicated region fallthrough
CT: control target
= control target key end

     0   :  { %11 = vsyncpa [#allocation3], 0  ;;  %s628_s0 = inlined_call_operand.vmem [shape: bf16[2,8,8], index: 0, kind: input, shape index: {}]   ;;  %s629_s1 = inlined_call_operand.vmem [shape: bf16[2,8,8], index: 1, kind: input, shape index: {}]   ;;  %s630_s2 = inlined_call_operand.vmem [shape: f32[2,8,1], index: 2, kind: input, shape index: {}]   ;;  %s631_s3 = inlined_call_operand.hbm [shape: bf16[8,32], index: 3, kind: input, shape index: {}]   ;;  %s632_s4 = inlined_call_operand.vmem [shape: bf16[32,32], index: 4, kind: input, shape index: {}]   ;;  %s633_s5 = inlined_call_operand.vmem [shape: f32[2,32], index: 5, kind: input, shape index: {}]   ;;  %s634_s6 = inlined_call_operand.hbm [shape: f32[2,128], index: 6, kind: output, shape index: {}]  }
   0x1   :  { %12 = vsyncpa [#allocation4], 0  ;;  %s520_s21 = smov [#allocation2]   ;;  %s472_s25 = scalar_lea.hbm %s631_s3, 64 }
   0x2   :  { %s25_s22 = sshll.u32 %s520_s21, 4  ;;  %p473_p0 = scmp.ne.s32.totalorder %s631_s3, %s472_s25  ;;  %s26_s22 = int_to_ptr.vmem [resolvable:$true] %s25_s22 }
   0x3   :  { %p476_p1 = scmp.lt.u32.totalorder %s472_s25, %s631_s3 }
   0x5   :  { %p478_p2 = pnand %p476_p1, %p473_p0 }
   0x7   :  { %481 = shalt.err (!%p478_p2)
}
   0x8   :  { %s482_s30 = scalar_lea.vmem %s26_s22, 64  ;;  %p487_p4 = scmp.lt.s32.totalorder %s26_s22, %s26_s22 }
   0x9   :  { %p483_p3 = scmp.ne.s32.totalorder %s26_s22, %s482_s30  ;;  %p488_p5 = scmp.lt.s32.totalorder %s482_s30, %s482_s30 }
   0xb   :  { %p489_p6 = por %p488_p5, %p487_p4 }
   0xd   :  { %p490_p7 = pnand %p489_p6, %p483_p3 }
   0xf   :  { %493 = shalt.err (!%p490_p7)
}
  0x10   :  { %28 = dma.hbm_to_vmem [thread:$0]  %s631_s3, 64, %s26_s22, [#allocation3]  }
  0x11   :  { %516 = dma.done.wait [#allocation3], 64  }
  0x12   :  { %517 = vsyncadd [#allocation3], 4294967232  ;;  %v521_v0 = vmov 0.0   ;;  %vm522_vm0 = vmmov 0   ;;  %vm52_vm1 = vcmask 1043456   ;;  %v469_v3 = vld [vmem:[%s629_s1] sm:$0xff]   ;;  %v99_v16 = vlaneseq }
  0x13   :  { %425 = vmatprep.subr.bf16.mxu0 %v521_v0  ;;  %427 = vmatprep.mubr.msk.bf16.mxu0 %vm522_vm0, %v521_v0  ;;  %v42_v1 = vld [vmem:[#allocation2] sm:$0xf]  ;;  %vm48_vm2 = vcmask 64512   ;;  %v38_v13 = vld [vmem:[%s628_s0 + $0x4] sm:$0xf]  ;;  %v471_v15 = vld [vmem:[%s632_s4 + $0x8] sm:$0xff]  }
  0x14   :  { %431 = vmatprep.subr.bf16.mxu1 %v521_v0  ;;  %433 = vmatprep.mubr.msk.bf16.mxu1 %vm522_vm0, %v521_v0  ;;  %v54_v2 = vsel %vm52_vm1, %v42_v1, 0  ;;  %v37_v11 = vld [vmem:[%s628_s0] sm:$0xf]  ;;  %v100_v17 = vshrl.u32 %v99_v16, 7  ;;  %vm214_vm3 = vcmask 261120   ;;  %v523_v35 = vmov 0  }
  0x15   :  { %426 = vmatpush3.bf16.msra.mxu0 %v54_v2  ;;  %v470_v14 = vld [vmem:[%s632_s4] sm:$0xff]   ;;  %468 = vset.pattern.permute.xlu0 %v523_v35  ;;  %v354_v36 = vld [vmem:[%s630_s2 + $0x8] sm:$0xff]  ;;  %vm383_vm4 = vcmask 1041409  }
  0x16   :  { %437 = vmatprep.subr.bf16.mxu0 %v521_v0  ;;  %v101_v18 = vsub.s32 0, %v100_v17  ;;  %v41_v19 = vld [vmem:[%s633_s5] sm:$0x3]  ;;  %v263_v45 = vsub.s32 1, %v100_v17 }
  0x17   :  { %v353_v34 = vld [vmem:[%s630_s2] sm:$0xff]  ;;  %s524_s2 = smov [#allocation5]  }
  0x18   :  { %428 = vmatmul.mubr.msk.bf16.vlgmr.msra.gmra.mrb[0].mxu0 %vm48_vm2, %v469_v3  ;;  %v102_v20 = vrot.slane %v41_v19, %v101_v18  ;;  %357 = vperm.xlu0 %468, %v353_v34   ;;  %v264_v46 = vrot.slane %v41_v19, %v263_v45  ;;  %s394_s20 = sshll.u32 %s524_s2, 4  ;;  %s395_s20 = int_to_ptr.vmem [resolvable:$true] %s394_s20 }
  0x19   :  { %439 = vmatprep.mubr.msk.bf16.mxu0 %vm522_vm0, %v521_v0  ;;  %s494_s21 = scalar_lea.vmem %s395_s20, 32  ;;  %p499_p9 = scmp.lt.s32.totalorder %s395_s20, %s395_s20 }
  0x1a   :  { %p495_p8 = scmp.ne.s32.totalorder %s395_s20, %s494_s21  ;;  %p500_p10 = scmp.lt.s32.totalorder %s494_s21, %s494_s21 }
  0x1c   :  { %362 = vperm.xlu0 %468, %v354_v36   ;;  %p501_p11 = por %p500_p10, %p499_p9 }
  0x1e   :  { %p502_p12 = pnand %p501_p11, %p495_p8 }
  0x97   :  { %v358_v48 = vpop.permute.xlu0 %357 }
  0x9b   :  { %v363_v61 = vpop.permute.xlu0 %362 }
  0xeb   :  { %v90_v4 = vpop.f32.mrb[0].mxu0 }
  0xec   :  { %v97_v5 = vpack.c.bf16 %v90_v4, %v90_v4  ;;  %v429_v6 = vpop.f32.mrb[1].mxu0 }
  0xed   :  { %v93_v7 = vpop.f32.mrb[2].mxu0 }
  0xee   :  { %v98_v8 = vpack.c.bf16 %v93_v7, %v93_v7  ;;  %v430_v9 = vpop.f32.mrb[3].mxu0  ;;  %v107_v10 = vsel %vm52_vm1, %v97_v5, 0 }
  0xef   :  { %432 = vmatpush3.bf16.msra.mxu1 %v107_v10 }
  0xf0   :  { %v153_v12 = vsel %vm52_vm1, %v98_v8, 0  ;;  %443 = vmatprep.subr.bf16.mxu1 %v521_v0 }
  0xf1   :  { %438 = vmatpush3.bf16.msra.mxu0 %v153_v12 }
  0xf2   :  { %434 = vmatmul.mubr.msk.bf16.vlgmr.msra.gmra.mrb[0].mxu1 %vm48_vm2, %v37_v11  ;;  %451 = vmatprep.subr.bf16.mxu0 %v521_v0 }
  0xf3   :  { %447 = vmatprep.mubr.msk.bf16.mxu1 %vm522_vm0, %v521_v0  ;;  %444 = vmatpush3.bf16.msra.mxu1 %v470_v14 }
  0xf4   :  { %440 = vmatmul.mubr.msk.bf16.vlgmr.msra.gmra.mrb[4].mxu0 %vm48_vm2, %v38_v13  ;;  %445 = vmatprep.subr.bf16.mxu1 %v521_v0 }
  0xf5   :  { %453 = vmatprep.mubr.msk.bf16.mxu0 %vm522_vm0, %v521_v0 }
  0xf7   :  { %446 = vmatpush3.bf16.msra.mxu1 %v471_v15 }
  0xf8   :  { %457 = vmatprep.subr.bf16.mxu1 %v521_v0 }
 0x1c5   :  { %v143_v21 = vpop.f32.mrb[0].mxu1 }
 0x1c6   :  { %v144_v22 = vadd.f32 %v143_v21, %v102_v20  ;;  %v435_v23 = vpop.f32.mrb[1].mxu1 }
 0x1c7   :  { %v146_v24 = vpop.f32.mrb[2].mxu1  ;;  %v189_v25 = vpop.f32.mrb[4].mxu0 }
 0x1c8   :  { %v195_v26 = vmax.f32 %v144_v22, 0.0  ;;  %v190_v27 = vadd.f32 %v189_v25, %v102_v20  ;;  %v436_v28 = vpop.f32.mrb[3].mxu1  ;;  %v441_v29 = vpop.f32.mrb[5].mxu0 }
 0x1c9   :  { %v192_v30 = vpop.f32.mrb[6].mxu0 }
 0x1ca   :  { %v196_v31 = vmax.f32 %v190_v27, 0.0  ;;  %v442_v32 = vpop.f32.mrb[7].mxu0 }
 0x1cc   :  { %v197_v33 = vpack.c.bf16 %v196_v31, %v195_v26 }
 0x1ce   :  { %448 = vmatmul.mubr.msk.bf16.vlgmr.msra.gmra.mrb[4].mxu1 %vm214_vm3, %v197_v33 }
 0x1cf   :  { %459 = vmatprep.mubr.msk.bf16.mxu1 %vm522_vm0, %v521_v0 }
 0x2a1   :  { %v252_v37 = vpop.f32.mrb[4].mxu1 }
 0x2a2   :  { %v259_v38 = vpack.c.bf16 %v252_v37, %v252_v37  ;;  %v449_v39 = vpop.f32.mrb[5].mxu1 }
 0x2a3   :  { %v255_v40 = vpop.f32.mrb[6].mxu1 }
 0x2a4   :  { %v266_v41 = vsel %vm52_vm1, %v259_v38, 0  ;;  %v260_v42 = vpack.c.bf16 %v255_v40, %v255_v40  ;;  %v450_v43 = vpop.f32.mrb[7].mxu1 }
 0x2a5   :  { %452 = vmatpush3.bf16.msra.mxu0 %v266_v41 }
 0x2a6   :  { %v309_v44 = vsel %vm52_vm1, %v260_v42, 0 }
 0x2a7   :  { %458 = vmatpush3.bf16.msra.mxu1 %v309_v44 }
 0x2a8   :  { %454 = vmatmul.mubr.msk.bf16.vlgmr.msra.gmra.mrb[8].mxu0 %vm48_vm2, %v37_v11 }
 0x2aa   :  { %460 = vmatmul.mubr.msk.bf16.vlgmr.msra.gmra.mrb[8].mxu1 %vm48_vm2, %v38_v13 }
 0x37b   :  { %v302_v47 = vpop.f32.mrb[8].mxu0 }
 0x37c   :  { %v303_v49 = vadd.f32 %v302_v47, %v264_v46  ;;  %v455_v50 = vpop.f32.mrb[9].mxu0 }
 0x37d   :  { %v345_v51 = vpop.f32.mrb[8].mxu1  ;;  %v305_v52 = vpop.f32.mrb[10].mxu0 }
 0x37e   :  { %v351_v53 = vmax.f32 %v303_v49, 0.0  ;;  %v346_v54 = vadd.f32 %v345_v51, %v264_v46  ;;  %v461_v55 = vpop.f32.mrb[9].mxu1  ;;  %v456_v56 = vpop.f32.mrb[11].mxu0 }
 0x37f   :  { %v348_v57 = vpop.f32.mrb[10].mxu1 }
 0x380   :  { %v365_v58 = vmul.f32 %v358_v48, %v351_v53  ;;  %v352_v59 = vmax.f32 %v346_v54, 0.0  ;;  %v462_v60 = vpop.f32.mrb[11].mxu1 }
 0x382   :  { %v367_v62 = vsel %vm214_vm3, %v365_v58, 0.0  ;;  %v366_v63 = vmul.f32 %v363_v61, %v352_v59 }
 0x383   :  { %v368_v0 = vrot.slane %v367_v62, 4 }
 0x384   :  { %v374_v1 = vsel %vm214_vm3, %v366_v63, 0.0 }
 0x385   :  { %v369_v2 = vadd.f32 %v368_v0, %v367_v62  ;;  %v375_v3 = vrot.slane %v374_v1, 4 }
 0x387   :  { %v370_v4 = vrot.slane %v369_v2, 2  ;;  %v376_v5 = vadd.f32 %v375_v3, %v374_v1 }
 0x389   :  { %v371_v6 = vadd.f32 %v370_v4, %v369_v2  ;;  %v377_v7 = vrot.slane %v376_v5, 2 }
 0x38b   :  { %v372_v8 = vrot.slane %v371_v6, 1  ;;  %v378_v9 = vadd.f32 %v377_v7, %v376_v5 }
 0x38d   :  { %v379_v10 = vrot.slane %v378_v9, 1  ;;  %v373_v11 = vadd.f32 %v372_v8, %v371_v6 }
 0x38f   :  { %v380_v12 = vadd.f32 %v379_v10, %v378_v9 }
 0x391   :  { %v384_v13 = vsel %vm383_vm4, %v380_v12, %v373_v11 }
 0x392   :  { %v386_v14 = vsel %vm214_vm3, %v384_v13, 0.0 }
 0x393   :  { %387 = vst [vmem:[#allocation5] sm:$0x3] %v386_v14 }
 0x394   :  { %505 = shalt.err (!%p502_p12)
}
 0x395   :  { %s506_s24 = scalar_lea.hbm %s634_s6, 32 }
 0x396   :  { %p507_p13 = scmp.ne.s32.totalorder %s634_s6, %s506_s24  ;;  %p510_p0 = scmp.lt.u32.totalorder %s506_s24, %s634_s6 }
 0x398   :  { %p512_p1 = pnand %p510_p0, %p507_p13 }
 0x39a   :  { %515 = shalt.err (!%p512_p1)
}
 0x39b   :  { %397 = dma.vmem_to_hbm [thread:$0]  %s395_s20, 32, %s634_s6, [#allocation4]  }
 0x39c   :  { %518 = dma.done.wait [#allocation4], 32  }
 0x39d   :  { %519 = vsyncadd [#allocation4], 4294967264 }
 0x39e   :  { %401 = vsyncpa [#allocation3], 1 }
 0x39f   :  { %402 = vsyncpa [#allocation4], 1 }

</bundles_post_ra>
